<compile_context>
chip_gen: v7x
topology: tpu7x:2x2x1
jax: 0.10.0
libtpu: 0.0.40
codegen_flags: <defaults>
</compile_context>

<pallas_src>
import functools

import jax
import jax.numpy as jnp
from jax.experimental import pallas as pl
from jax.experimental.pallas import tpu as pltpu


def _round_up(x: int, m: int) -> int:
    return (x + m - 1) // m * m


def _choose_block_m(B: int, block_m_cap: int) -> int:
    """Batch-tile rows: multiple of 16 (bf16 sublanes), >=2 tiles for big batches."""
    cap = max(16, _round_up(block_m_cap, 16))
    if B > cap:
        return cap
    if B >= 256:
        # v7x has 2 TensorCores; split into >= 2 "parallel" tiles once the batch
        # is large enough that the ~0.35us per-grid-step overhead is amortized.
        return _round_up(pl.cdiv(B, 2), 16)
    return B  # single full-extent block: always a legal block shape


def _mlp_kernel(x_ref, w0_ref, b0_ref, wr_ref, br_ref, o_ref, *, n_rest: int):
    """Fused MLP on one [block_m, Din] tile of activations.

    x_ref  : (block_m, Din)          input dtype (cast to bf16 in-kernel)
    w0_ref : (Din, H_pad)            bf16   first Linear
    b0_ref : (1, H_pad)              f32
    wr_ref : (n_rest, H_pad, H_pad)  bf16   remaining Linears (last has no ReLU)
    br_ref : (n_rest, 1, H_pad)      f32
    o_ref  : (block_m, H_pad)        bf16   lane-dense (128) store
    """
    h = x_ref[...].astype(jnp.bfloat16)
    # First Linear + ReLU (the module always has ReLU after the first layer).
    y = jnp.dot(h, w0_ref[...], preferred_element_type=jnp.float32) + b0_ref[...]
    y = jnp.maximum(y, 0.0)
    # Remaining layers, unrolled (n_rest is a static Python int).  Activations
    # stay in registers/VMEM only -- no HBM traffic between layers.
    # TODO(synk): for deep (compute-bound) nets, run hidden matmuls at the true
    # H (unpadded) and only pad the final stored layer to 128 lanes.
    for l in range(n_rest):
        h = y.astype(jnp.bfloat16)
        y = jnp.dot(h, wr_ref[l], preferred_element_type=jnp.float32) + br_ref[l]
        if l < n_rest - 1:                                # final Linear: no ReLU
            y = jnp.maximum(y, 0.0)
    o_ref[...] = y.astype(o_ref.dtype)


def pack_subnet_params(params):
    """Pad + pack SubNet params ONCE (call outside the hot loop).

    Zero padding of weight rows/cols and bias lanes keeps the math exact.
    """
    n_layers = len(params)
    assert n_layers >= 2, "SubNet always has at least 2 Linear layers"
    Din, H = params[0][0].shape
    H_pad = _round_up(H, 128)

    w0, b0 = params[0]
    w0p = jnp.zeros((Din, H_pad), jnp.bfloat16).at[:, :H].set(w0.astype(jnp.bfloat16))
    b0p = jnp.zeros((1, H_pad), jnp.float32).at[0, :H].set(b0.astype(jnp.float32))

    n_rest = n_layers - 1
    wr = jnp.zeros((n_rest, H_pad, H_pad), jnp.bfloat16)
    br = jnp.zeros((n_rest, 1, H_pad), jnp.float32)
    for l, (w, b) in enumerate(params[1:]):
        wr = wr.at[l, :H, :H].set(w.astype(jnp.bfloat16))
        br = br.at[l, 0, :H].set(b.astype(jnp.float32))

    # Guard the resident (double-buffered) weight stack against v7x's 64 MiB VMEM.
    resident_param_bytes = (w0p.size + wr.size) * 2 + (b0p.size + br.size) * 4
    # TODO(synk): stream the layer axis (memory_space=pl.ANY + manual per-layer
    # double-buffer) instead of keeping the whole stack resident when this grows.
    if 2 * resident_param_bytes > 48 * 1024 * 1024:
        raise ValueError("resident SubNet weight stack too large for v7x VMEM; "
                         "stream the layer axis instead of keeping it resident")

    return {"w0": w0p, "b0": b0p, "wr": wr, "br": br,
            "hidden_dim": H, "input_dim": Din}


def subnet_forward(x, packed, *, block_m_cap: int = 512, trim_lanes: bool = False):
    """Fused-Pallas forward matching SubNet: (Linear->ReLU)*num_layers, Linear.

    Returns a (B, H_pad) bf16 slab whose valid columns are [:hidden_dim];
    pass trim_lanes=True for the exact (B, hidden_dim) module output (costs an
    extra XLA slice pass over the result).
    """
    B, Din = x.shape
    assert Din == packed["input_dim"]
    w0p, b0p, wr, br = packed["w0"], packed["b0"], packed["wr"], packed["br"]
    H = packed["hidden_dim"]
    H_pad = w0p.shape[1]
    n_rest = wr.shape[0]

    block_m = _choose_block_m(B, block_m_cap)
    grid_m = pl.cdiv(B, block_m)

    # VMEM budget from actual buffer sizes (covers v5e's 16 MiB default scoped
    # VMEM): double-buffered params + x/out tiles + f32 intermediate headroom.
    need = (2 * ((w0p.size + wr.size) * 2 + (b0p.size + br.size) * 4)
            + 2 * block_m * Din * x.dtype.itemsize
            + 2 * block_m * H_pad * 2
            + 6 * block_m * H_pad * 4)
    vmem_limit = int(min(100 * 1024 * 1024, max(4 * 1024 * 1024, 2 * need)))

    kernel = functools.partial(_mlp_kernel, n_rest=n_rest)
    out = pl.pallas_call(
        kernel,
        out_shape=jax.ShapeDtypeStruct((B, H_pad), jnp.bfloat16),
        grid_spec=pltpu.PrefetchScalarGridSpec(
            num_scalar_prefetch=0,
            grid=(grid_m,),
            in_specs=[
                # x fed directly (no wrapper pad/cast); ragged last block is
                # handled by Pallas (row-independent math, masked writeback).
                pl.BlockSpec((block_m, Din), lambda i: (i, 0)),
                # Grid-invariant operands (weights/biases), fetched once; a few
                # tens of KiB at hidden_dim=64, so double-buffering is negligible.
                pl.BlockSpec((Din, H_pad), lambda i: (0, 0)),
                pl.BlockSpec((1, H_pad), lambda i: (0, 0)),
                pl.BlockSpec((n_rest, H_pad, H_pad), lambda i: (0, 0, 0)),
                pl.BlockSpec((n_rest, 1, H_pad), lambda i: (0, 0, 0)),
            ],
            out_specs=pl.BlockSpec((block_m, H_pad), lambda i: (i, 0)),
        ),
        compiler_params=pltpu.CompilerParams(
            dimension_semantics=("parallel",),     # shards batch tiles over TCs
            vmem_limit_bytes=vmem_limit,
        ),
    )(x, w0p, b0p, wr, br)

    if trim_lanes:
        return out[:, :H]
    return out


def init_subnet_params(key, input_dim, num_layers, hidden_dim=64):
    """Deterministic init matching SubNet.__init__ layer shapes.

    Linear layers:
      0:                Linear(input_dim, hidden_dim)   (+ReLU)
      1..num_layers-1:  Linear(hidden_dim, hidden_dim)  (+ReLU)
      final:            Linear(hidden_dim, hidden_dim)  (no ReLU)
    Weights stored as (in, out) = PyTorch weight.T so y = x @ W + b.
    """
    dims = [(input_dim, hidden_dim)]
    dims += [(hidden_dim, hidden_dim)] * (num_layers - 1)
    dims += [(hidden_dim, hidden_dim)]
    params = []
    for (d_in, d_out) in dims:
        key, kw, kb = jax.random.split(key, 3)
        bound = 1.0 / (d_in ** 0.5)              # same scale as nn.Linear default
        w = jax.random.uniform(kw, (d_in, d_out), jnp.float32, -bound, bound)
        b = jax.random.uniform(kb, (d_out,), jnp.float32, -bound, bound)
        params.append((w, b))
    return params


def _subnet_reference(x, params):
    """Pure-JAX reference with the same bf16-matmul / f32-accumulate recipe."""
    n = len(params)
    h = x
    for i, (w, b) in enumerate(params):
        y = jnp.dot(h.astype(jnp.bfloat16), w.astype(jnp.bfloat16),
                    preferred_element_type=jnp.float32) + b
        if i < n - 1:
            y = jnp.maximum(y, 0.0)
        h = y
    return h


def _subnet_reference_f32(x, params):
    """Full-f32 reference (PyTorch semantics) for a looser sanity check."""
    n = len(params)
    h = x
    for i, (w, b) in enumerate(params):
        h = h @ w + b
        if i < n - 1:
            h = jnp.maximum(h, 0.0)
    return h


if __name__ == "__main__":
    # Small deterministic example consistent with the module defaults.
    batch = 8
    input_dim = 16
    hidden_dim = 64
    num_layers = 2

    key = jax.random.PRNGKey(0)
    key, kx = jax.random.split(key)
    x = jax.random.normal(kx, (batch, input_dim), jnp.float32)
    params = init_subnet_params(key, input_dim, num_layers, hidden_dim)
    packed = pack_subnet_params(params)          # packing done ONCE, off the hot path

    out_pad = jax.block_until_ready(subnet_forward(x, packed))
    assert out_pad.shape[0] == batch
    out = out_pad[:, :hidden_dim].astype(jnp.float32)

    ref = _subnet_reference(x, params)
    assert jnp.allclose(out, ref, atol=3e-2, rtol=3e-2), \
        float(jnp.max(jnp.abs(out - ref)))
    ref32 = _subnet_reference_f32(x, params)
    assert jnp.allclose(out, ref32, atol=8e-2, rtol=8e-2), \
        float(jnp.max(jnp.abs(out - ref32)))

    # Exact module-shaped output path (optional lane trim).
    out_trim = jax.block_until_ready(subnet_forward(x, packed, trim_lanes=True))
    assert out_trim.shape == (batch, hidden_dim)

    # Second check: ragged batch with grid > 1 (exercises boundary-block reads
    # and masked writeback of the out-of-range rows in the final tile).
    key, kx2 = jax.random.split(key)
    x2 = jax.random.normal(kx2, (260, input_dim), jnp.float32)
    out2 = jax.block_until_ready(subnet_forward(x2, packed, block_m_cap=128))
    out2 = out2[:, :hidden_dim].astype(jnp.float32)
    ref2 = _subnet_reference(x2, params)
    assert out2.shape == (260, hidden_dim)
    assert jnp.allclose(out2, ref2, atol=3e-2, rtol=3e-2), \
        float(jnp.max(jnp.abs(out2 - ref2)))

    # Third check: batch large enough to trigger the v7x two-tile split path.
    key, kx3 = jax.random.split(key)
    x3 = jax.random.normal(kx3, (320, input_dim), jnp.float32)
    out3 = jax.block_until_ready(subnet_forward(x3, packed))
    out3 = out3[:, :hidden_dim].astype(jnp.float32)
    ref3 = _subnet_reference(x3, params)
    assert jnp.allclose(out3, ref3, atol=3e-2, rtol=3e-2), \
        float(jnp.max(jnp.abs(out3 - ref3)))

    print("KERNEL_OK")
</pallas_src>

<mosaic_0001>
module attributes {stable_mosaic.version = 11 : i64} {
  func.func @_mlp_kernel(%arg0: i32, %arg1: memref<8x16xf32, #tpu.memory_space<vmem>>, %arg2: memref<16x128xbf16, #tpu.memory_space<vmem>>, %arg3: memref<1x128xf32, #tpu.memory_space<vmem>>, %arg4: memref<2x128x128xbf16, #tpu.memory_space<vmem>>, %arg5: memref<2x1x128xf32, #tpu.memory_space<vmem>>, %arg6: memref<8x128xbf16, #tpu.memory_space<vmem>>) attributes {dimension_semantics = [#tpu.dimension_semantics<parallel>], iteration_bounds = array<i64: 1>, scalar_prefetch = 0 : i64, scratch_operands = 0 : i64, tpu.core_type = #tpu.core_type<tc>, window_params = [{transform_indices = @transform_0, window_bounds = array<i64: 8, 16>}, {pipeline_mode = #tpu.pipeline_mode<synchronous>, transform_indices = @transform_1, window_bounds = array<i64: 16, 128>}, {pipeline_mode = #tpu.pipeline_mode<synchronous>, transform_indices = @transform_2, window_bounds = array<i64: 1, 128>}, {pipeline_mode = #tpu.pipeline_mode<synchronous>, transform_indices = @transform_3, window_bounds = array<i64: 2, 128, 128>}, {pipeline_mode = #tpu.pipeline_mode<synchronous>, transform_indices = @transform_4, window_bounds = array<i64: 2, 1, 128>}, {transform_indices = @transform_5, window_bounds = array<i64: 8, 128>}]} {
    %c0 = arith.constant 0 : index
    %c0_0 = arith.constant 0 : index
    %0 = vector.load %arg1[%c0, %c0_0] : memref<8x16xf32, #tpu.memory_space<vmem>>, vector<8x16xf32>
    %1 = arith.truncf %0 : vector<8x16xf32> to vector<8x16xbf16>
    %c0_1 = arith.constant 0 : index
    %c0_2 = arith.constant 0 : index
    %2 = vector.load %arg2[%c0_1, %c0_2] : memref<16x128xbf16, #tpu.memory_space<vmem>>, vector<16x128xbf16>
    %cst = arith.constant dense<0.000000e+00> : vector<8x128xf32>
    %3 = tpu.matmul %1, %2, %cst {dimension_numbers = #tpu.dot_dimension_numbers<[1], [0], [0], [1], [0, 0, 1, 1], [], []>} : vector<8x16xbf16>, vector<16x128xbf16>, vector<8x128xf32> -> vector<8x128xf32>
    %c0_3 = arith.constant 0 : index
    %c0_4 = arith.constant 0 : index
    %4 = vector.load %arg3[%c0_3, %c0_4] : memref<1x128xf32, #tpu.memory_space<vmem>>, vector<1x128xf32>
    %5 = vector.broadcast %4 : vector<1x128xf32> to vector<8x128xf32>
    %6 = arith.addf %3, %5 : vector<8x128xf32>
    %cst_5 = arith.constant 0.000000e+00 : f32
    %7 = vector.broadcast %cst_5 : f32 to vector<8x128xf32>
    %8 = arith.maximumf %6, %7 : vector<8x128xf32>
    %9 = arith.truncf %8 : vector<8x128xf32> to vector<8x128xbf16>
    %c0_6 = arith.constant 0 : index
    %c0_7 = arith.constant 0 : index
    %c0_8 = arith.constant 0 : index
    %10 = vector.load %arg4[%c0_6, %c0_7, %c0_8] : memref<2x128x128xbf16, #tpu.memory_space<vmem>>, vector<1x128x128xbf16>
    %11 = vector.shape_cast %10 : vector<1x128x128xbf16> to vector<128x128xbf16>
    %cst_9 = arith.constant dense<0.000000e+00> : vector<8x128xf32>
    %12 = tpu.matmul %9, %11, %cst_9 {dimension_numbers = #tpu.dot_dimension_numbers<[1], [0], [0], [1], [0, 0, 1, 1], [], []>} : vector<8x128xbf16>, vector<128x128xbf16>, vector<8x128xf32> -> vector<8x128xf32>
    %c0_10 = arith.constant 0 : index
    %c0_11 = arith.constant 0 : index
    %c0_12 = arith.constant 0 : index
    %13 = vector.load %arg5[%c0_10, %c0_11, %c0_12] : memref<2x1x128xf32, #tpu.memory_space<vmem>>, vector<1x1x128xf32>
    %14 = vector.shape_cast %13 : vector<1x1x128xf32> to vector<1x128xf32>
    %15 = vector.broadcast %14 : vector<1x128xf32> to vector<8x128xf32>
    %16 = arith.addf %12, %15 : vector<8x128xf32>
    %cst_13 = arith.constant 0.000000e+00 : f32
    %17 = vector.broadcast %cst_13 : f32 to vector<8x128xf32>
    %18 = arith.maximumf %16, %17 : vector<8x128xf32>
    %19 = arith.truncf %18 : vector<8x128xf32> to vector<8x128xbf16>
    %c1 = arith.constant 1 : index
    %c0_14 = arith.constant 0 : index
    %c0_15 = arith.constant 0 : index
    %20 = vector.load %arg4[%c1, %c0_14, %c0_15] : memref<2x128x128xbf16, #tpu.memory_space<vmem>>, vector<1x128x128xbf16>
    %21 = vector.shape_cast %20 : vector<1x128x128xbf16> to vector<128x128xbf16>
    %cst_16 = arith.constant dense<0.000000e+00> : vector<8x128xf32>
    %22 = tpu.matmul %19, %21, %cst_16 {dimension_numbers = #tpu.dot_dimension_numbers<[1], [0], [0], [1], [0, 0, 1, 1], [], []>} : vector<8x128xbf16>, vector<128x128xbf16>, vector<8x128xf32> -> vector<8x128xf32>
    %c1_17 = arith.constant 1 : index
    %c0_18 = arith.constant 0 : index
    %c0_19 = arith.constant 0 : index
    %23 = vector.load %arg5[%c1_17, %c0_18, %c0_19] : memref<2x1x128xf32, #tpu.memory_space<vmem>>, vector<1x1x128xf32>
    %24 = vector.shape_cast %23 : vector<1x1x128xf32> to vector<1x128xf32>
    %25 = vector.broadcast %24 : vector<1x128xf32> to vector<8x128xf32>
    %26 = arith.addf %22, %25 : vector<8x128xf32>
    %27 = arith.truncf %26 : vector<8x128xf32> to vector<8x128xbf16>
    %c0_20 = arith.constant 0 : index
    %c0_21 = arith.constant 0 : index
    %28 = vector.load %arg6[%c0_20, %c0_21] : memref<8x128xbf16, #tpu.memory_space<vmem>>, vector<8x128xbf16>
    tpu.vector_store %arg6[%c0_20, %c0_21], %27 {strides = array<i32>} : memref<8x128xbf16, #tpu.memory_space<vmem>>, vector<8x128xbf16>,
    return
  }
  func.func @transform_0(%arg0: i32) -> (i32, i32) {
    %c0_i32 = arith.constant 0 : i32
    %c0_i32_0 = arith.constant 0 : i32
    return %arg0, %c0_i32 : i32, i32
  }
  func.func @transform_1(%arg0: i32) -> (i32, i32) {
    %c0_i32 = arith.constant 0 : i32
    %c0_i32_0 = arith.constant 0 : i32
    %c0_i32_1 = arith.constant 0 : i32
    return %c0_i32, %c0_i32_0 : i32, i32
  }
  func.func @transform_2(%arg0: i32) -> (i32, i32) {
    %c0_i32 = arith.constant 0 : i32
    %c0_i32_0 = arith.constant 0 : i32
    %c0_i32_1 = arith.constant 0 : i32
    return %c0_i32, %c0_i32_0 : i32, i32
  }
  func.func @transform_3(%arg0: i32) -> (i32, i32, i32) {
    %c0_i32 = arith.constant 0 : i32
    %c0_i32_0 = arith.constant 0 : i32
    %c0_i32_1 = arith.constant 0 : i32
    %c0_i32_2 = arith.constant 0 : i32
    return %c0_i32, %c0_i32_0, %c0_i32_1 : i32, i32, i32
  }
  func.func @transform_4(%arg0: i32) -> (i32, i32, i32) {
    %c0_i32 = arith.constant 0 : i32
    %c0_i32_0 = arith.constant 0 : i32
    %c0_i32_1 = arith.constant 0 : i32
    %c0_i32_2 = arith.constant 0 : i32
    return %c0_i32, %c0_i32_0, %c0_i32_1 : i32, i32, i32
  }
  func.func @transform_5(%arg0: i32) -> (i32, i32) {
    %c0_i32 = arith.constant 0 : i32
    %c0_i32_0 = arith.constant 0 : i32
    return %arg0, %c0_i32 : i32, i32
  }
}

</mosaic_0001>

<bundles_post_ra>
// kernel: tpu_custom_call.1
= control target key start
LH: loop header
LB: loop body
LE: loop exit
PB: predicated region body
PF: predicated region fallthrough
CT: control target
= control target key end

     0   :  { %10 = vsyncpa [#allocation3], 0  ;;  %s696_s0 = inlined_call_operand.hbm [shape: f32[8,16], index: 0, kind: input, shape index: {}]   ;;  %s697_s1 = inlined_call_operand.hbm [shape: bf16[16,128], index: 1, kind: input, shape index: {}]   ;;  %s698_s2 = inlined_call_operand.vmem [shape: f32[1,128], index: 2, kind: input, shape index: {}]   ;;  %s699_s3 = inlined_call_operand.hbm [shape: bf16[2,128,128], index: 3, kind: input, shape index: {}]   ;;  %s700_s4 = inlined_call_operand.vmem [shape: f32[2,1,128], index: 4, kind: input, shape index: {}]   ;;  %s701_s5 = inlined_call_operand.hbm [shape: bf16[8,128], index: 5, kind: output, shape index: {}]  }
   0x1   :  { %11 = vsyncpa [#allocation6], 0 }
   0x2   :  { %12 = vsyncpa [#allocation4], 0  ;;  %s575_s18 = smov [#allocation5]   ;;  %s481_s22 = scalar_lea.hbm %s697_s1, 128 }
   0x3   :  { %s28_s19 = sshll.u32 %s575_s18, 4  ;;  %p482_p0 = scmp.ne.s32.totalorder %s697_s1, %s481_s22  ;;  %s29_s19 = int_to_ptr.vmem [resolvable:$true] %s28_s19 }
   0x4   :  { %p485_p1 = scmp.lt.u32.totalorder %s481_s22, %s697_s1 }
   0x6   :  { %p487_p2 = pnand %p485_p1, %p482_p0 }
   0x8   :  { %490 = shalt.err (!%p487_p2)
}
   0x9   :  { %s491_s27 = scalar_lea.vmem %s29_s19, 128  ;;  %p496_p4 = scmp.lt.s32.totalorder %s29_s19, %s29_s19 }
   0xa   :  { %p492_p3 = scmp.ne.s32.totalorder %s29_s19, %s491_s27  ;;  %p497_p5 = scmp.lt.s32.totalorder %s491_s27, %s491_s27 }
   0xc   :  { %p498_p6 = por %p497_p5, %p496_p4 }
   0xe   :  { %p499_p7 = pnand %p498_p6, %p492_p3 }
  0x10   :  { %502 = shalt.err (!%p499_p7)
}
  0x11   :  { %s576_s28 = smov 64   ;;  %s577_s29 = smov 4  }
  0x12   :  { %34 = dma.hbm_to_vmem [thread:$0]  %s697_s1, 128, %s29_s19, [#allocation6], %s576_s28, %s576_s28, %s577_s29  }
  0x13   :  { %s578_s7 = smov [#allocation2]   ;;  %s579_s9 = smov [#allocation7]  }
  0x14   :  { %s19_s8 = sshll.u32 %s578_s7, 4  ;;  %s42_s10 = sshll.u32 %s579_s9, 4  ;;  %s20_s8 = int_to_ptr.vmem [resolvable:$true] %s19_s8  ;;  %s43_s10 = int_to_ptr.vmem [resolvable:$true] %s42_s10 }
  0x15   :  { %s503_s13 = scalar_lea.hbm %s696_s0, 128 }
  0x16   :  { %p504_p8 = scmp.ne.s32.totalorder %s696_s0, %s503_s13  ;;  %p507_p9 = scmp.lt.u32.totalorder %s503_s13, %s696_s0 }
  0x18   :  { %p509_p10 = pnand %p507_p9, %p504_p8 }
  0x1a   :  { %512 = shalt.err (!%p509_p10)
}
  0x1b   :  { %s513_s1 = scalar_lea.vmem %s20_s8, 128  ;;  %p518_p12 = scmp.lt.s32.totalorder %s20_s8, %s20_s8 }
  0x1c   :  { %p514_p11 = scmp.ne.s32.totalorder %s20_s8, %s513_s1  ;;  %p519_p13 = scmp.lt.s32.totalorder %s513_s1, %s513_s1 }
  0x1e   :  { %p520_p0 = por %p519_p13, %p518_p12 }
  0x20   :  { %p521_p1 = pnand %p520_p0, %p514_p11 }
  0x22   :  { %524 = shalt.err (!%p521_p1)
}
  0x23   :  { %22 = dma.hbm_to_vmem [thread:$0]  %s696_s0, 128, %s20_s8, [#allocation3]  }
  0x24   :  { %s525_s22 = scalar_lea.hbm %s699_s3, 2048 }
  0x25   :  { %p526_p2 = scmp.ne.s32.totalorder %s699_s3, %s525_s22  ;;  %p529_p3 = scmp.lt.u32.totalorder %s525_s22, %s699_s3 }
  0x27   :  { %p531_p4 = pnand %p529_p3, %p526_p2 }
  0x29   :  { %534 = shalt.err (!%p531_p4)
}
  0x2a   :  { %s535_s27 = scalar_lea.vmem %s43_s10, 2048  ;;  %p540_p6 = scmp.lt.s32.totalorder %s43_s10, %s43_s10 }
  0x2b   :  { %p536_p5 = scmp.ne.s32.totalorder %s43_s10, %s535_s27  ;;  %p541_p7 = scmp.lt.s32.totalorder %s535_s27, %s535_s27 }
  0x2d   :  { %p542_p8 = por %p541_p7, %p540_p6 }
  0x2f   :  { %p543_p9 = pnand %p542_p8, %p536_p5 }
  0x31   :  { %546 = shalt.err (!%p543_p9)
}
  0x32   :  { %48 = dma.hbm_to_vmem [thread:$0]  %s699_s3, 2048, %s43_s10, [#allocation6], %s576_s28, %s576_s28, %s577_s29  }
  0x33   :  { %569 = dma.done.wait [#allocation3], 128  }
  0x34   :  { %570 = vsyncadd [#allocation3], 4294967168 }
  0x35   :  { %571 = dma.done.wait [#allocation6], 2176  }
  0x36   :  { %572 = vsyncadd [#allocation6], 4294965120  ;;  %v580_v0 = vmov 0.0   ;;  %vm581_vm0 = vmmov 0   ;;  %v464_v1 = vld [vmem:[#allocation5] sm:$0xff]   ;;  %v61_v2 = vld [vmem:[#allocation2] sm:$0xff] }
  0x37   :  { %410 = vmatprep.subr.bf16.mxu0 %v580_v0  ;;  %412 = vmatprep.mubr.msk.bf16.mxu0 %vm581_vm0, %v580_v0  ;;  %v62_v3 = vpack.c.bf16 %v61_v2, %v61_v2  ;;  %vm78_vm1 = vcmask 130048   ;;  %v465_v4 = vld [vmem:[#allocation7] sm:$0xff]   ;;  %v466_v5 = vld [vmem:[#allocation7 + $0x8] sm:$0xff]   ;;  %v467_v6 = vld [vmem:[#allocation7 + $0x10] sm:$0xff]   ;;  %s582_s8 = smov [#allocation8]  }
  0x38   :  { %416 = vmatprep.subr.bf16.mxu1 %v580_v0  ;;  %432 = vmatprep.mubr.msk.bf16.mxu1 %vm581_vm0, %v580_v0  ;;  %v468_v7 = vld [vmem:[#allocation7 + $0x18] sm:$0xff]   ;;  %v469_v8 = vld [vmem:[#allocation7 + $0x20] sm:$0xff]   ;;  %v470_v9 = vld [vmem:[#allocation7 + $0x28] sm:$0xff]   ;;  %s358_s9 = sshll.u32 %s582_s8, 4  ;;  %s359_s9 = int_to_ptr.vmem [resolvable:$true] %s358_s9 }
  0x39   :  { %411 = vmatpush3.bf16.msra.mxu0 %v464_v1  ;;  %417 = vmatpush3.bf16.msra.mxu1 %v465_v4  ;;  %v471_v10 = vld [vmem:[#allocation7 + $0x30] sm:$0xff]   ;;  %v472_v11 = vld [vmem:[#allocation7 + $0x38] sm:$0xff]   ;;  %v473_v12 = vld [vmem:[#allocation7 + $0x40] sm:$0xff]   ;;  %s547_s10 = scalar_lea.vmem %s359_s9, 64  ;;  %p552_p11 = scmp.lt.s32.totalorder %s359_s9, %s359_s9 }
  0x3a   :  { %436 = vmatprep.subr.bf16.mxu0 %v580_v0  ;;  %418 = vmatprep.subr.bf16.mxu1 %v580_v0  ;;  %v474_v13 = vld [vmem:[#allocation7 + $0x48] sm:$0xff]   ;;  %v475_v14 = vld [vmem:[#allocation7 + $0x50] sm:$0xff]   ;;  %v476_v15 = vld [vmem:[#allocation7 + $0x58] sm:$0xff]   ;;  %p548_p10 = scmp.ne.s32.totalorder %s359_s9, %s547_s10  ;;  %p553_p12 = scmp.lt.s32.totalorder %s547_s10, %s547_s10 }
  0x3b   :  { %v477_v16 = vld [vmem:[#allocation7 + $0x60] sm:$0xff]   ;;  %v478_v17 = vld [vmem:[#allocation7 + $0x68] sm:$0xff]   ;;  %v368_v18 = vld [vmem:[%s698_s2] ss:$0 sm:$0xff] }
  0x3c   :  { %413 = vmatmul.mubr.msk.bf16.vlgmr.msra.gmra.mrb[0].mxu0 %vm78_vm1, %v62_v3  ;;  %v479_v26 = vld [vmem:[#allocation7 + $0x70] sm:$0xff]   ;;  %v480_v27 = vld [vmem:[#allocation7 + $0x78] sm:$0xff]   ;;  %p554_p13 = por %p553_p12, %p552_p11 }
  0x3d   :  { %452 = vmatprep.mubr.msk.bf16.mxu0 %vm581_vm0, %v580_v0  ;;  %419 = vmatpush3.bf16.msra.mxu1 %v466_v5  ;;  %v371_v28 = vld [vmem:[%s700_s4] ss:$0 sm:$0xff]  ;;  %v381_v36 = vld [vmem:[%s700_s4 + $0x1] ss:$0 sm:$0xff] }
  0x3e   :  { %420 = vmatprep.subr.bf16.mxu1 %v580_v0  ;;  %437 = vmatpush3.bf16.msra.mxu0 %v473_v12  ;;  %p555_p0 = pnand %p554_p13, %p548_p10 }
  0x3f   :  { %438 = vmatprep.subr.bf16.mxu0 %v580_v0 }
  0x41   :  { %421 = vmatpush3.bf16.msra.mxu1 %v467_v6 }
  0x42   :  { %422 = vmatprep.subr.bf16.mxu1 %v580_v0  ;;  %439 = vmatpush3.bf16.msra.mxu0 %v474_v13 }
  0x43   :  { %440 = vmatprep.subr.bf16.mxu0 %v580_v0 }
  0x45   :  { %423 = vmatpush3.bf16.msra.mxu1 %v468_v7 }
  0x46   :  { %424 = vmatprep.subr.bf16.mxu1 %v580_v0  ;;  %441 = vmatpush3.bf16.msra.mxu0 %v475_v14 }
  0x47   :  { %442 = vmatprep.subr.bf16.mxu0 %v580_v0 }
  0x49   :  { %425 = vmatpush3.bf16.msra.mxu1 %v469_v8 }
  0x4a   :  { %426 = vmatprep.subr.bf16.mxu1 %v580_v0  ;;  %443 = vmatpush3.bf16.msra.mxu0 %v476_v15 }
  0x4b   :  { %444 = vmatprep.subr.bf16.mxu0 %v580_v0 }
  0x4d   :  { %427 = vmatpush3.bf16.msra.mxu1 %v470_v9 }
  0x4e   :  { %428 = vmatprep.subr.bf16.mxu1 %v580_v0  ;;  %445 = vmatpush3.bf16.msra.mxu0 %v477_v16 }
  0x4f   :  { %446 = vmatprep.subr.bf16.mxu0 %v580_v0 }
  0x51   :  { %429 = vmatpush3.bf16.msra.mxu1 %v471_v10 }
  0x52   :  { %430 = vmatprep.subr.bf16.mxu1 %v580_v0  ;;  %447 = vmatpush3.bf16.msra.mxu0 %v478_v17 }
  0x53   :  { %448 = vmatprep.subr.bf16.mxu0 %v580_v0 }
  0x55   :  { %431 = vmatpush3.bf16.msra.mxu1 %v472_v11 }
  0x56   :  { %449 = vmatpush3.bf16.msra.mxu0 %v479_v26 }
  0x57   :  { %450 = vmatprep.subr.bf16.mxu0 %v580_v0 }
  0x5a   :  { %451 = vmatpush3.bf16.msra.mxu0 %v480_v27 }
 0x10f   :  { %v116_v19 = vpop.f32.mrb[0].mxu0 }
 0x110   :  { %v117_v20 = vadd.f32 %v368_v18, %v116_v19  ;;  %v414_v21 = vpop.f32.mrb[1].mxu0 }
 0x111   :  { %v119_v22 = vpop.f32.mrb[2].mxu0 }
 0x112   :  { %v122_v23 = vmax.f32 %v117_v20, 0.0  ;;  %v415_v24 = vpop.f32.mrb[3].mxu0 }
 0x114   :  { %v123_v25 = vpack.c.bf16 %v122_v23, %v122_v23 }
 0x116   :  { %433 = vmatmul.mubr.bf16.vlgmr.msra.gmra.mrb[0].mxu1 %v123_v25 }
 0x1e9   :  { %v229_v29 = vpop.f32.mrb[0].mxu1 }
 0x1ea   :  { %v230_v30 = vadd.f32 %v371_v28, %v229_v29  ;;  %v434_v31 = vpop.f32.mrb[1].mxu1 }
 0x1eb   :  { %v232_v32 = vpop.f32.mrb[2].mxu1 }
 0x1ec   :  { %v235_v33 = vmax.f32 %v230_v30, 0.0  ;;  %v435_v34 = vpop.f32.mrb[3].mxu1 }
 0x1ee   :  { %v236_v35 = vpack.c.bf16 %v235_v33, %v235_v33 }
 0x1f0   :  { %453 = vmatmul.mubr.bf16.vlgmr.msra.gmra.mrb[4].mxu0 %v236_v35 }
 0x2c3   :  { %v344_v37 = vpop.f32.mrb[4].mxu0 }
 0x2c4   :  { %v345_v38 = vadd.f32 %v381_v36, %v344_v37  ;;  %v454_v39 = vpop.f32.mrb[5].mxu0 }
 0x2c5   :  { %v347_v40 = vpop.f32.mrb[6].mxu0 }
 0x2c6   :  { %v350_v41 = vpack.c.bf16 %v345_v38, %v345_v38  ;;  %v455_v42 = vpop.f32.mrb[7].mxu0 }
 0x2c8   :  { %351 = vst [vmem:[#allocation8] sm:$0xf] %v350_v41 }
 0x2c9   :  { %558 = shalt.err (!%p555_p0)
}
 0x2ca   :  { %s559_s4 = scalar_lea.hbm %s701_s5, 64 }
 0x2cb   :  { %p560_p1 = scmp.ne.s32.totalorder %s701_s5, %s559_s4  ;;  %p563_p2 = scmp.lt.u32.totalorder %s559_s4, %s701_s5 }
 0x2cd   :  { %p565_p3 = pnand %p563_p2, %p560_p1 }
 0x2cf   :  { %568 = shalt.err (!%p565_p3)
}
 0x2d0   :  { %361 = dma.vmem_to_hbm [thread:$0]  %s359_s9, 64, %s701_s5, [#allocation4]  }
 0x2d1   :  { %573 = dma.done.wait [#allocation4], 64  }
 0x2d2   :  { %574 = vsyncadd [#allocation4], 4294967232 }
 0x2d3   :  { %365 = vsyncpa [#allocation3], 1 }
 0x2d4   :  { %366 = vsyncpa [#allocation6], 1 }
 0x2d5   :  { %367 = vsyncpa [#allocation4], 1 }

</bundles_post_ra>
